<compile_context>
chip_gen: v5e
topology: v5e:2x2
jax: 0.10.0
libtpu: 0.0.40
codegen_flags: <defaults>
</compile_context>

<pallas_src>
from functools import partial

import jax
import jax.numpy as jnp
from jax import lax
from jax.experimental import pallas as pl
from jax.experimental.pallas import tpu as pltpu

LANE = 128
MAX_BLOCK_ROWS = 2048  # (2048, 128) f32 tile = 1 MiB per input per buffer.


def _mixed_loss_kernel(x_ref, t_ref, out_ref,
                       acc_focal, acc_inter, acc_st,
                       *, gamma, normalize, block_rows):
    c = pl.program_id(1)  # sequential reduction axis

    @pl.when(c == 0)
    def _init():
        acc_focal[...] = jnp.zeros_like(acc_focal)
        acc_inter[...] = jnp.zeros_like(acc_inter)
        acc_st[...] = jnp.zeros_like(acc_st)

    # Stream at native dtype, upcast in-kernel.
    x = x_ref[...].astype(jnp.float32)
    t = t_ref[...].astype(jnp.float32)

    if normalize:
        # target[target >= 3] -= 3 ; target = target != 0
        # == (t != 0) & (t != 3) for all real t (2 fewer VPU ops/elem).
        t = jnp.logical_and(t != 0.0, t != 3.0).astype(jnp.float32)

    # z = -x * (2t - 1); one shared stable softplus gives logsigmoid and (for
    # binary targets) the BCE-with-logits term as well.
    z = -x * (t * 2.0 - 1.0)
    e_z = jnp.exp(-jnp.abs(z))
    softplus_z = jnp.log(1.0 + e_z)
    logsig = jnp.minimum(z, 0.0) - softplus_z          # F.logsigmoid(z)

    if normalize:
        # Binary targets: BCE-with-logits == max(z,0) + softplus(-|z|).
        bce = jnp.maximum(z, 0.0) + softplus_z
        prob = jnp.exp(logsig)                         # sigmoid(z)
        g = float(gamma)
        if g == 1.0:
            weight = prob
        elif g == 2.0:
            weight = prob * prob                       # integer-gamma fast path
        elif g == 3.0:
            weight = prob * prob * prob
        else:
            weight = jnp.exp(logsig * g)
        # sigmoid(x): t==1 -> 1 - sigmoid(z), t==0 -> sigmoid(z).
        sig = jnp.where(t > 0.5, 1.0 - prob, prob)
    else:
        # General (possibly non-binary) targets.
        e_x = jnp.exp(-jnp.abs(x))
        sp_x = jnp.log(1.0 + e_x)                      # log1p(exp(-|x|))
        # x - x*t + max(-x,0) + log(exp(-max)+exp(-x-max)) == max(x,0) - x*t + sp_x
        bce = jnp.maximum(x, 0.0) - x * t + sp_x
        weight = jnp.exp(logsig * float(gamma))
        sig = jnp.exp(jnp.minimum(x, 0.0) - sp_x)      # sigmoid(x), no divide

    # Vreg-sized accumulators: fold each term's sublane blocks with plain
    # vreg-wise VALU adds (no XLU, no full-tile accumulator store stream).
    nsub = block_rows // 8

    def fold(v):
        return jnp.sum(v.reshape(nsub, 8, LANE), axis=0)

    acc_focal[...] += fold(weight * bce)
    acc_inter[...] += fold(sig * t)
    acc_st[...] += fold(sig + t)          # dice only needs sum(sig) + sum(t)

    @pl.when(c == pl.num_programs(1) - 1)
    def _finalize():
        s0 = jnp.sum(acc_focal[...])
        s1 = jnp.sum(acc_inter[...])
        s2 = jnp.sum(acc_st[...])
        lane = lax.broadcasted_iota(jnp.int32, (8, LANE), 1)
        out_ref[0] = jnp.where(lane == 0, s0,
                     jnp.where(lane == 1, s1,
                     jnp.where(lane == 2, s2, 0.0)))


def _num_parallel_cores():
    """Parallel grid split only on chips with >1 TensorCore per chip."""
    try:
        kind = jax.devices()[0].device_kind.lower()
    except Exception:
        return 1
    if ("v7" in kind) or ("v4" in kind) or ("v5p" in kind):
        return 2
    return 1


def _partial_sums_jax(x, t, *, gamma, normalize):
    """Pure-JAX partial sums (sum(focal), sum(sig*t), sum(sig)+sum(t)).

    Used for the (small) ragged tail and as the reference building block;
    mirrors the PyTorch formulas exactly."""
    x = x.astype(jnp.float32)
    t = t.astype(jnp.float32)
    if normalize:
        t = jnp.where(t >= 3.0, t - 3.0, t)
        t = (t != 0.0).astype(jnp.float32)
    max_val = jnp.maximum(-x, 0.0)
    bce = x - x * t + max_val + jnp.log(jnp.exp(-max_val) + jnp.exp(-x - max_val))
    logsig = jax.nn.log_sigmoid(-x * (t * 2.0 - 1.0))
    focal = jnp.exp(logsig * gamma) * bce
    sig = jax.nn.sigmoid(x)
    return jnp.sum(focal), jnp.sum(sig * t), jnp.sum(sig) + jnp.sum(t)


@partial(jax.jit, static_argnames=("gamma", "normalize"))
def mixed_loss(x, target, *, alpha, gamma, normalize=True):
    """Pallas implementation of MixedLoss.forward(input, target)."""
    n = x.size
    xf = x.reshape(-1)
    tf = target.reshape(-1)

    rows_avail = n // LANE
    P = _num_parallel_cores()
    if rows_avail < 8 * P:
        P = 1

    if rows_avail < 8:
        # Too small for an (8, 128) tile: pure JAX.
        s_focal, s_inter, s_st = _partial_sums_jax(xf, tf, gamma=gamma, normalize=normalize)
    else:
        # Block geometry: balanced chunks close to MAX_BLOCK_ROWS so the kernel
        # covers (almost) all full 128-wide rows with zero padding streamed.
        rows_per_core = rows_avail // P
        n_chunks = -(-rows_per_core // MAX_BLOCK_ROWS)
        block_rows = max(8, min(MAX_BLOCK_ROWS, (rows_per_core // n_chunks // 8) * 8))
        C = rows_per_core // block_rows
        rows_main = P * C * block_rows
        main_elems = rows_main * LANE

        if n % LANE == 0:
            # Free (no-copy) reshape; the kernel only visits in-bounds blocks.
            x2 = xf.reshape(rows_avail, LANE)
            t2 = tf.reshape(rows_avail, LANE)
        else:
            # One prefix copy only when n is not lane-aligned (no full jnp.pad).
            x2 = xf[: rows_avail * LANE].reshape(rows_avail, LANE)
            t2 = tf[: rows_avail * LANE].reshape(rows_avail, LANE)

        kernel = partial(_mixed_loss_kernel, gamma=float(gamma),
                         normalize=bool(normalize), block_rows=int(block_rows))

        in_spec = pl.BlockSpec((block_rows, LANE), lambda p, c: (p * C + c, 0))
        out = pl.pallas_call(
            kernel,
            out_shape=jax.ShapeDtypeStruct((P, 8, LANE), jnp.float32),
            grid=(P, C),
            in_specs=[in_spec, in_spec],
            out_specs=pl.BlockSpec((1, 8, LANE), lambda p, c: (p, 0, 0)),
            scratch_shapes=[pltpu.VMEM((8, LANE), jnp.float32)] * 3,
            compiler_params=pltpu.CompilerParams(
                dimension_semantics=("parallel", "arbitrary"),
                vmem_limit_bytes=32 * 1024 * 1024,
            ),
        )(x2, t2)

        # Combine per-core partials (tiny scalar glue in JAX).
        partials = jnp.sum(out[:, 0, :3], axis=0)
        s_focal, s_inter, s_st = partials[0], partials[1], partials[2]

        # Ragged tail (< one superblock): a few fused pure-JAX ops, no padding.
        if main_elems < n:
            tfoc, tint, tst = _partial_sums_jax(xf[main_elems:], tf[main_elems:],
                                                gamma=gamma, normalize=normalize)
            s_focal = s_focal + tfoc
            s_inter = s_inter + tint
            s_st = s_st + tst

    focal_mean = s_focal / n
    dice = (2.0 * s_inter + 1.0) / (s_st + 1.0)
    # loss.mean() on a 0-d tensor is a no-op.
    return alpha * focal_mean - jnp.log(dice)


def _reference_mixed_loss(x, target, *, alpha, gamma, normalize=True):
    """Pure-JAX reference mirroring the PyTorch module, for verification."""
    s_focal, s_inter, s_st = _partial_sums_jax(x.reshape(-1), target.reshape(-1),
                                               gamma=gamma, normalize=normalize)
    dice = (2.0 * s_inter + 1.0) / (s_st + 1.0)
    return alpha * (s_focal / x.size) - jnp.log(dice)


def _check(x, target, *, alpha, gamma, normalize):
    loss = mixed_loss(x, target, alpha=alpha, gamma=gamma, normalize=normalize)
    loss = jax.block_until_ready(loss)
    ref = _reference_mixed_loss(x, target, alpha=alpha, gamma=gamma, normalize=normalize)
    assert jnp.allclose(loss, ref, rtol=1e-4, atol=1e-4), (loss, ref)
    return loss


if __name__ == "__main__":
    key = jax.random.PRNGKey(0)
    k1, k2, k3, k4, k5, k6 = jax.random.split(key, 6)
    alpha, gamma = 10.0, 2.0

    # Primary: NCHW segmentation-style inputs matching the PyTorch module.
    x = jax.random.normal(k1, (2, 4, 16, 16), dtype=jnp.float32)
    target = jax.random.randint(k2, (2, 4, 16, 16), 0, 6).astype(jnp.float32)
    _check(x, target, alpha=alpha, gamma=gamma, normalize=True)

    # Ragged size (exercises the kernel-prefix + pure-JAX-tail split).
    x_r = jax.random.normal(k3, (3, 5, 21, 17), dtype=jnp.float32)
    t_r = jax.random.randint(k4, (3, 5, 21, 17), 0, 6).astype(jnp.float32)
    _check(x_r, t_r, alpha=alpha, gamma=gamma, normalize=True)

    # Multi-block case (lane-aligned: no padding, no copies, multi-chunk grid).
    x_m = jax.random.normal(k5, (4, 4, 160, 160), dtype=jnp.float32)
    t_m = jax.random.randint(k6, (4, 4, 160, 160), 0, 6).astype(jnp.float32)
    _check(x_m, t_m, alpha=alpha, gamma=gamma, normalize=True)

    # normalize=False path (general non-binary targets, full BCE formula).
    t_f = jax.random.uniform(k4, (2, 4, 16, 16), dtype=jnp.float32)
    _check(x, t_f, alpha=alpha, gamma=gamma, normalize=False)

    print("KERNEL_OK")
</pallas_src>

<mosaic_0001>
module attributes {stable_mosaic.version = 11 : i64} {
  func.func @_mixed_loss_kernel(%arg0: i32, %arg1: i32, %arg2: memref<16x128xf32, #tpu.memory_space<vmem>>, %arg3: memref<16x128xf32, #tpu.memory_space<vmem>>, %arg4: memref<1x8x128xf32, #tpu.memory_space<vmem>>, %arg5: memref<8x128xf32, #tpu.memory_space<vmem>>, %arg6: memref<8x128xf32, #tpu.memory_space<vmem>>, %arg7: memref<8x128xf32, #tpu.memory_space<vmem>>) attributes {dimension_semantics = [#tpu.dimension_semantics<parallel>, #tpu.dimension_semantics<arbitrary>], iteration_bounds = array<i64: 1, 1>, scalar_prefetch = 0 : i64, scratch_operands = 3 : i64, tpu.core_type = #tpu.core_type<tc>, window_params = [{transform_indices = @transform_0, window_bounds = array<i64: 16, 128>}, {transform_indices = @transform_1, window_bounds = array<i64: 16, 128>}, {transform_indices = @transform_2, window_bounds = array<i64: 1, 8, 128>}]} {
    %c0_i32 = arith.constant 0 : i32
    %0 = arith.cmpi eq, %arg1, %c0_i32 : i32
    %1 = arith.extui %0 : i1 to i32
    %c0_i32_0 = arith.constant 0 : i32
    %2 = arith.cmpi ne, %1, %c0_i32_0 : i32
    scf.if %2 {
      %cst_31 = arith.constant 0.000000e+00 : f32
      %60 = vector.broadcast %cst_31 : f32 to vector<8x128xf32>
      %c0_32 = arith.constant 0 : index
      %c0_33 = arith.constant 0 : index
      %61 = vector.load %arg5[%c0_32, %c0_33] : memref<8x128xf32, #tpu.memory_space<vmem>>, vector<8x128xf32>
      tpu.vector_store %arg5[%c0_32, %c0_33], %60 {strides = array<i32>} : memref<8x128xf32, #tpu.memory_space<vmem>>, vector<8x128xf32>,
      %cst_34 = arith.constant 0.000000e+00 : f32
      %62 = vector.broadcast %cst_34 : f32 to vector<8x128xf32>
      %c0_35 = arith.constant 0 : index
      %c0_36 = arith.constant 0 : index
      %63 = vector.load %arg6[%c0_35, %c0_36] : memref<8x128xf32, #tpu.memory_space<vmem>>, vector<8x128xf32>
      tpu.vector_store %arg6[%c0_35, %c0_36], %62 {strides = array<i32>} : memref<8x128xf32, #tpu.memory_space<vmem>>, vector<8x128xf32>,
      %cst_37 = arith.constant 0.000000e+00 : f32
      %64 = vector.broadcast %cst_37 : f32 to vector<8x128xf32>
      %c0_38 = arith.constant 0 : index
      %c0_39 = arith.constant 0 : index
      %65 = vector.load %arg7[%c0_38, %c0_39] : memref<8x128xf32, #tpu.memory_space<vmem>>, vector<8x128xf32>
      tpu.vector_store %arg7[%c0_38, %c0_39], %64 {strides = array<i32>} : memref<8x128xf32, #tpu.memory_space<vmem>>, vector<8x128xf32>,
    } else {
    }
    %c0 = arith.constant 0 : index
    %c0_1 = arith.constant 0 : index
    %3 = vector.load %arg2[%c0, %c0_1] : memref<16x128xf32, #tpu.memory_space<vmem>>, vector<16x128xf32>
    %c0_2 = arith.constant 0 : index
    %c0_3 = arith.constant 0 : index
    %4 = vector.load %arg3[%c0_2, %c0_3] : memref<16x128xf32, #tpu.memory_space<vmem>>, vector<16x128xf32>
    %cst = arith.constant 0.000000e+00 : f32
    %5 = vector.broadcast %cst : f32 to vector<16x128xf32>
    %6 = arith.cmpf one, %4, %5 : vector<16x128xf32>
    %cst_4 = arith.constant 3.000000e+00 : f32
    %7 = vector.broadcast %cst_4 : f32 to vector<16x128xf32>
    %8 = arith.cmpf one, %4, %7 : vector<16x128xf32>
    %9 = arith.andi %6, %8 : vector<16x128xi1>
    %10 = arith.extui %9 : vector<16x128xi1> to vector<16x128xi32>
    %11 = arith.sitofp %10 : vector<16x128xi32> to vector<16x128xf32>
    %cst_5 = arith.constant 0.000000e+00 : f32
    %12 = vector.broadcast %cst_5 : f32 to vector<16x128xf32>
    %13 = arith.subf %12, %3 : vector<16x128xf32>
    %cst_6 = arith.constant 2.000000e+00 : f32
    %14 = vector.broadcast %cst_6 : f32 to vector<16x128xf32>
    %15 = arith.mulf %11, %14 : vector<16x128xf32>
    %cst_7 = arith.constant 1.000000e+00 : f32
    %16 = vector.broadcast %cst_7 : f32 to vector<16x128xf32>
    %17 = arith.subf %15, %16 : vector<16x128xf32>
    %18 = arith.mulf %13, %17 : vector<16x128xf32>
    %19 = math.absf %18 : vector<16x128xf32>
    %cst_8 = arith.constant 0.000000e+00 : f32
    %20 = vector.broadcast %cst_8 : f32 to vector<16x128xf32>
    %21 = arith.subf %20, %19 : vector<16x128xf32>
    %22 = math.exp %21 : vector<16x128xf32>
    %cst_9 = arith.constant 1.000000e+00 : f32
    %23 = vector.broadcast %cst_9 : f32 to vector<16x128xf32>
    %24 = arith.addf %23, %22 : vector<16x128xf32>
    %25 = math.log %24 : vector<16x128xf32>
    %cst_10 = arith.constant 0.000000e+00 : f32
    %26 = vector.broadcast %cst_10 : f32 to vector<16x128xf32>
    %27 = arith.minimumf %18, %26 : vector<16x128xf32>
    %28 = arith.subf %27, %25 : vector<16x128xf32>
    %cst_11 = arith.constant 0.000000e+00 : f32
    %29 = vector.broadcast %cst_11 : f32 to vector<16x128xf32>
    %30 = arith.maximumf %18, %29 : vector<16x128xf32>
    %31 = arith.addf %30, %25 : vector<16x128xf32>
    %32 = math.exp %28 : vector<16x128xf32>
    %33 = arith.mulf %32, %32 : vector<16x128xf32>
    %cst_12 = arith.constant 5.000000e-01 : f32
    %34 = vector.broadcast %cst_12 : f32 to vector<16x128xf32>
    %35 = arith.cmpf ogt, %11, %34 : vector<16x128xf32>
    %cst_13 = arith.constant 1.000000e+00 : f32
    %36 = vector.broadcast %cst_13 : f32 to vector<16x128xf32>
    %37 = arith.subf %36, %32 : vector<16x128xf32>
    %38 = arith.select %35, %37, %32 : vector<16x128xi1>, vector<16x128xf32>
    %c0_14 = arith.constant 0 : index
    %c0_15 = arith.constant 0 : index
    %39 = vector.load %arg5[%c0_14, %c0_15] : memref<8x128xf32, #tpu.memory_space<vmem>>, vector<8x128xf32>
    %40 = arith.mulf %33, %31 : vector<16x128xf32>
    %41 = vector.shape_cast %40 : vector<16x128xf32> to vector<2x8x128xf32>
    %cst_16 = arith.constant dense<0.000000e+00> : vector<8x128xf32>
    %42 = vector.multi_reduction <add>, %41, %cst_16 [0] : vector<2x8x128xf32> to vector<8x128xf32>
    %43 = arith.addf %39, %42 : vector<8x128xf32>
    %c0_17 = arith.constant 0 : index
    %c0_18 = arith.constant 0 : index
    %44 = vector.load %arg5[%c0_17, %c0_18] : memref<8x128xf32, #tpu.memory_space<vmem>>, vector<8x128xf32>
    tpu.vector_store %arg5[%c0_17, %c0_18], %43 {strides = array<i32>} : memref<8x128xf32, #tpu.memory_space<vmem>>, vector<8x128xf32>,
    %c0_19 = arith.constant 0 : index
    %c0_20 = arith.constant 0 : index
    %45 = vector.load %arg6[%c0_19, %c0_20] : memref<8x128xf32, #tpu.memory_space<vmem>>, vector<8x128xf32>
    %46 = arith.mulf %38, %11 : vector<16x128xf32>
    %47 = vector.shape_cast %46 : vector<16x128xf32> to vector<2x8x128xf32>
    %cst_21 = arith.constant dense<0.000000e+00> : vector<8x128xf32>
    %48 = vector.multi_reduction <add>, %47, %cst_21 [0] : vector<2x8x128xf32> to vector<8x128xf32>
    %49 = arith.addf %45, %48 : vector<8x128xf32>
    %c0_22 = arith.constant 0 : index
    %c0_23 = arith.constant 0 : index
    %50 = vector.load %arg6[%c0_22, %c0_23] : memref<8x128xf32, #tpu.memory_space<vmem>>, vector<8x128xf32>
    tpu.vector_store %arg6[%c0_22, %c0_23], %49 {strides = array<i32>} : memref<8x128xf32, #tpu.memory_space<vmem>>, vector<8x128xf32>,
    %c0_24 = arith.constant 0 : index
    %c0_25 = arith.constant 0 : index
    %51 = vector.load %arg7[%c0_24, %c0_25] : memref<8x128xf32, #tpu.memory_space<vmem>>, vector<8x128xf32>
    %52 = arith.addf %38, %11 : vector<16x128xf32>
    %53 = vector.shape_cast %52 : vector<16x128xf32> to vector<2x8x128xf32>
    %cst_26 = arith.constant dense<0.000000e+00> : vector<8x128xf32>
    %54 = vector.multi_reduction <add>, %53, %cst_26 [0] : vector<2x8x128xf32> to vector<8x128xf32>
    %55 = arith.addf %51, %54 : vector<8x128xf32>
    %c0_27 = arith.constant 0 : index
    %c0_28 = arith.constant 0 : index
    %56 = vector.load %arg7[%c0_27, %c0_28] : memref<8x128xf32, #tpu.memory_space<vmem>>, vector<8x128xf32>
    tpu.vector_store %arg7[%c0_27, %c0_28], %55 {strides = array<i32>} : memref<8x128xf32, #tpu.memory_space<vmem>>, vector<8x128xf32>,
    %c0_i32_29 = arith.constant 0 : i32
    %57 = arith.cmpi eq, %arg1, %c0_i32_29 : i32
    %58 = arith.extui %57 : i1 to i32
    %c0_i32_30 = arith.constant 0 : i32
    %59 = arith.cmpi ne, %58, %c0_i32_30 : i32
    scf.if %59 {
      %c0_31 = arith.constant 0 : index
      %c0_32 = arith.constant 0 : index
      %60 = vector.load %arg5[%c0_31, %c0_32] : memref<8x128xf32, #tpu.memory_space<vmem>>, vector<8x128xf32>
      %61 = vector.shape_cast %60 : vector<8x128xf32> to vector<1x8x128xf32>
      %cst_33 = arith.constant dense<0.000000e+00> : vector<1xf32>
      %62 = vector.multi_reduction <add>, %61, %cst_33 [1, 2] : vector<1x8x128xf32> to vector<1xf32>
      %63 = vector.shape_cast %62 : vector<1xf32> to vector<1x1x1xf32>
      %64 = vector.extract %63[0, 0, 0] : f32 from vector<1x1x1xf32>
      %c0_34 = arith.constant 0 : index
      %c0_35 = arith.constant 0 : index
      %65 = vector.load %arg6[%c0_34, %c0_35] : memref<8x128xf32, #tpu.memory_space<vmem>>, vector<8x128xf32>
      %66 = vector.shape_cast %65 : vector<8x128xf32> to vector<1x8x128xf32>
      %cst_36 = arith.constant dense<0.000000e+00> : vector<1xf32>
      %67 = vector.multi_reduction <add>, %66, %cst_36 [1, 2] : vector<1x8x128xf32> to vector<1xf32>
      %68 = vector.shape_cast %67 : vector<1xf32> to vector<1x1x1xf32>
      %69 = vector.extract %68[0, 0, 0] : f32 from vector<1x1x1xf32>
      %c0_37 = arith.constant 0 : index
      %c0_38 = arith.constant 0 : index
      %70 = vector.load %arg7[%c0_37, %c0_38] : memref<8x128xf32, #tpu.memory_space<vmem>>, vector<8x128xf32>
      %71 = vector.shape_cast %70 : vector<8x128xf32> to vector<1x8x128xf32>
      %cst_39 = arith.constant dense<0.000000e+00> : vector<1xf32>
      %72 = vector.multi_reduction <add>, %71, %cst_39 [1, 2] : vector<1x8x128xf32> to vector<1xf32>
      %73 = vector.shape_cast %72 : vector<1xf32> to vector<1x1x1xf32>
      %74 = vector.extract %73[0, 0, 0] : f32 from vector<1x1x1xf32>
      %75 = tpu.iota {dimensions = array<i32: 1>} : vector<8x128xi32>
      %c0_i32_40 = arith.constant 0 : i32
      %76 = vector.broadcast %c0_i32_40 : i32 to vector<8x128xi32>
      %77 = arith.cmpi eq, %75, %76 : vector<8x128xi32>
      %c1_i32 = arith.constant 1 : i32
      %78 = vector.broadcast %c1_i32 : i32 to vector<8x128xi32>
      %79 = arith.cmpi eq, %75, %78 : vector<8x128xi32>
      %c2_i32 = arith.constant 2 : i32
      %80 = vector.broadcast %c2_i32 : i32 to vector<8x128xi32>
      %81 = arith.cmpi eq, %75, %80 : vector<8x128xi32>
      %cst_41 = arith.constant 0.000000e+00 : f32
      %82 = vector.broadcast %74 : f32 to vector<8x128xf32>
      %83 = vector.broadcast %cst_41 : f32 to vector<8x128xf32>
      %84 = arith.select %81, %82, %83 : vector<8x128xi1>, vector<8x128xf32>
      %85 = vector.broadcast %69 : f32 to vector<8x128xf32>
      %86 = arith.select %79, %85, %84 : vector<8x128xi1>, vector<8x128xf32>
      %87 = vector.broadcast %64 : f32 to vector<8x128xf32>
      %88 = arith.select %77, %87, %86 : vector<8x128xi1>, vector<8x128xf32>
      %c0_42 = arith.constant 0 : index
      %c0_43 = arith.constant 0 : index
      %c0_44 = arith.constant 0 : index
      %89 = vector.load %arg4[%c0_42, %c0_43, %c0_44] : memref<1x8x128xf32, #tpu.memory_space<vmem>>, vector<1x8x128xf32>
      %90 = vector.shape_cast %89 : vector<1x8x128xf32> to vector<8x128xf32>
      %91 = vector.shape_cast %88 : vector<8x128xf32> to vector<1x8x128xf32>
      tpu.vector_store %arg4[%c0_42, %c0_43, %c0_44], %91 {strides = array<i32>} : memref<1x8x128xf32, #tpu.memory_space<vmem>>, vector<1x8x128xf32>,
    } else {
    }
    return
  }
  func.func @transform_0(%arg0: i32, %arg1: i32) -> (i32, i32) {
    %c1_i32 = arith.constant 1 : i32
    %0 = arith.muli %arg0, %c1_i32 : i32
    %1 = arith.addi %0, %arg1 : i32
    %c0_i32 = arith.constant 0 : i32
    %c0_i32_0 = arith.constant 0 : i32
    return %1, %c0_i32 : i32, i32
  }
  func.func @transform_1(%arg0: i32, %arg1: i32) -> (i32, i32) {
    %c1_i32 = arith.constant 1 : i32
    %0 = arith.muli %arg0, %c1_i32 : i32
    %1 = arith.addi %0, %arg1 : i32
    %c0_i32 = arith.constant 0 : i32
    %c0_i32_0 = arith.constant 0 : i32
    return %1, %c0_i32 : i32, i32
  }
  func.func @transform_2(%arg0: i32, %arg1: i32) -> (i32, i32, i32) {
    %c0_i32 = arith.constant 0 : i32
    %c0_i32_0 = arith.constant 0 : i32
    %c0_i32_1 = arith.constant 0 : i32
    return %arg0, %c0_i32, %c0_i32_0 : i32, i32, i32
  }
}

</mosaic_0001>

<bundles_post_ra>
// kernel: mixed_loss.1
= control target key start
LH: loop header
LB: loop body
LE: loop exit
PB: predicated region body
PF: predicated region fallthrough
CT: control target
= control target key end

     0   :  { %v220_v4 = vmov 0.0   ;;  %s251_s0 = inlined_call_operand.vmem [shape: f32[16,128], index: 0, kind: input, shape index: {}]   ;;  %s252_s1 = inlined_call_operand.vmem [shape: f32[16,128], index: 1, kind: input, shape index: {}]   ;;  %s253_s2 = inlined_call_operand.vmem [shape: f32[1,8,128], index: 2, kind: output, shape index: {}]  }
   0x1   :  { %v64_v0 = vld [vmem:[%s252_s1] sm:$0xff]  ;;  %v65_v2 = vld [vmem:[%s252_s1 + $0x8] sm:$0xff] }
   0x2   :  { %v62_v1 = vld [vmem:[%s251_s0] sm:$0xff]  ;;  %vm66_vm0 = vcmp.ne.f32.partialorder %v64_v0, 0.0  ;;  %vm68_vm1 = vcmp.ne.f32.partialorder %v64_v0, 3.0  ;;  %v63_v3 = vld [vmem:[%s251_s0 + $0x8] sm:$0xff]  ;;  %vm67_vm2 = vcmp.ne.f32.partialorder %v65_v2, 0.0  ;;  %vm69_vm3 = vcmp.ne.f32.partialorder %v65_v2, 3.0 }
   0x3   :  { %vm70_vm4 = vmand %vm66_vm0, %vm68_vm1  ;;  %v76_v7 = vsub.f32 0.0, %v62_v1  ;;  %v77_v9 = vsub.f32 0.0, %v63_v3 }
   0x4   :  { %vm71_vm5 = vmand %vm67_vm2, %vm69_vm3  ;;  %v197_v5 = vsel %vm70_vm4, 1.0, %v220_v4 }
   0x5   :  { %v198_v6 = vsel %vm71_vm5, 1.0, %v220_v4  ;;  %v78_v8 = vmul.f32 2.0, %v197_v5  ;;  %vm112_vm6 = vcmp.gt.f32.partialorder %v197_v5, 0.5 }
   0x6   :  { %v79_v10 = vmul.f32 2.0, %v198_v6  ;;  %vm113_vm7 = vcmp.gt.f32.partialorder %v198_v6, 0.5 }
   0x7   :  { %v199_v11 = vadd.f32 -1.0, %v78_v8 }
   0x8   :  { %v200_v12 = vadd.f32 -1.0, %v79_v10 }
   0x9   :  { %v82_v13 = vmul.f32 %v199_v11, %v76_v7 }
   0xa   :  { %v83_v14 = vmul.f32 %v200_v12, %v77_v9 }
   0xb   :  { %v84_v15 = vand.u32 2147483647, %v82_v13  ;;  %v98_v25 = vmin.f32 %v82_v13, 0.0  ;;  %v102_v35 = vmax.f32 %v82_v13, 0.0  ;;  %v169_v13 = vlaneseq }
   0xc   :  { %v85_v16 = vand.u32 2147483647, %v83_v14  ;;  %v99_v27 = vmin.f32 %v83_v14, 0.0  ;;  %v103_v36 = vmax.f32 %v83_v14, 0.0 }
   0xd   :  { %v86_v17 = vsub.f32 0.0, %v84_v15  ;;  %v170_v14 = vand.u32 127, %v169_v13 }
   0xe   :  { %v87_v18 = vsub.f32 0.0, %v85_v16 }
   0xf   :  { %v88_v19 = vmul.f32 1.442695, %v86_v17  ;;  %vm173_vm8 = vcmp.eq.s32.totalorder %v170_v14, 2  ;;  %vm172_vm9 = vcmp.eq.s32.totalorder %v170_v14, 1  ;;  %vm171_vm10 = vcmp.eq.s32.totalorder %v170_v14, 0 }
  0x10   :  { %v90_v20 = vmul.f32 1.442695, %v87_v18 }
  0x11   :  { %208 = vpow2.f32 %v88_v19 }
  0x12   :  { %210 = vpow2.f32 %v90_v20 }
  0x17   :  { %v209_v21 = vpop.eup %208 }
  0x18   :  { %v211_v22 = vpop.eup %210  ;;  %v92_v23 = vadd.f32 1.0, %v209_v21 }
  0x19   :  { %v93_v24 = vadd.f32 1.0, %v211_v22 }
  0x1a   :  { %212 = vlog2.f32 %v92_v23 }
  0x1b   :  { %214 = vlog2.f32 %v93_v24 }
  0x20   :  { %v213_v26 = vpop.eup %212 }
  0x21   :  { %v215_v28 = vpop.eup %214  ;;  %v95_v29 = vmul.f32 0.6931472, %v213_v26 }
  0x22   :  { %v97_v30 = vmul.f32 0.6931472, %v215_v28 }
  0x23   :  { %v100_v31 = vsub.f32 %v98_v25, %v95_v29  ;;  %v104_v37 = vadd.f32 %v102_v35, %v95_v29 }
  0x24   :  { %v101_v32 = vsub.f32 %v99_v27, %v97_v30  ;;  %v105_v39 = vadd.f32 %v103_v36, %v97_v30 }
  0x25   :  { %v106_v33 = vmul.f32 1.442695, %v100_v31 }
  0x26   :  { %v108_v34 = vmul.f32 1.442695, %v101_v32 }
  0x27   :  { %216 = vpow2.f32 %v106_v33 }
  0x28   :  { %218 = vpow2.f32 %v108_v34 }
  0x2d   :  { %v217_v38 = vpop.eup %216 }
  0x2e   :  { %v219_v40 = vpop.eup %218  ;;  %v110_v41 = vmul.f32 %v217_v38, %v217_v38  ;;  %v114_v42 = vsub.f32 1.0, %v217_v38 }
  0x2f   :  { %v111_v43 = vmul.f32 %v219_v40, %v219_v40  ;;  %v115_v44 = vsub.f32 1.0, %v219_v40 }
  0x30   :  { %v119_v45 = vmul.f32 %v110_v41, %v104_v37  ;;  %v116_v46 = vsel %vm112_vm6, %v114_v42, %v217_v38 }
  0x31   :  { %v120_v47 = vmul.f32 %v111_v43, %v105_v39  ;;  %v117_v48 = vsel %vm113_vm7, %v115_v44, %v219_v40  ;;  %v131_v49 = vadd.f32 %v197_v5, %v116_v46  ;;  %v125_v53 = vmul.f32 %v197_v5, %v116_v46 }
  0x32   :  { %v132_v50 = vadd.f32 %v198_v6, %v117_v48  ;;  %v126_v54 = vmul.f32 %v198_v6, %v117_v48 }
  0x33   :  { %v121_v51 = vadd.f32 %v120_v47, %v119_v45 }
  0x34   :  { %v133_v52 = vadd.f32 %v132_v50, %v131_v49  ;;  %v127_v55 = vadd.f32 %v126_v54, %v125_v53 }
  0x35   :  { %140 = vadd.xlane.f32.xlu0 %v121_v51 }
  0x36   :  { %160 = vadd.xlane.f32.xlu1 %v133_v52 }
  0x3d   :  { %150 = vadd.xlane.f32.xlu0 %v127_v55 }
  0xa8   :  { %v141_v56 = vpop.xlane.xlu0 %140 }
  0xa9   :  { %v142_v57 = vrot.slane %v141_v56, 4  ;;  %v161_v58 = vpop.xlane.xlu1 %160 }
  0xaa   :  { %v162_v59 = vrot.slane %v161_v58, 4 }
  0xab   :  { %v143_v60 = vadd.f32 %v142_v57, %v141_v56 }
  0xac   :  { %v163_v61 = vadd.f32 %v162_v59, %v161_v58 }
  0xad   :  { %v144_v62 = vrot.slane %v143_v60, 2 }
  0xae   :  { %v164_v0 = vrot.slane %v163_v61, 2 }
  0xaf   :  { %v145_v63 = vadd.f32 %v144_v62, %v143_v60 }
  0xb0   :  { %v151_v1 = vpop.xlane.xlu0 %150  ;;  %v165_v8 = vadd.f32 %v164_v0, %v163_v61 }
  0xb1   :  { %v152_v2 = vrot.slane %v151_v1, 4  ;;  %v146_v3 = vrot.slane %v145_v63, 1 }
  0xb2   :  { %v166_v9 = vrot.slane %v165_v8, 1 }
  0xb3   :  { %v153_v4 = vadd.f32 %v152_v2, %v151_v1  ;;  %v147_v7 = vadd.f32 %v146_v3, %v145_v63 }
  0xb4   :  { %v167_v12 = vadd.f32 %v166_v9, %v165_v8 }
  0xb5   :  { %v154_v5 = vrot.slane %v153_v4, 2  ;;  %201 = vpush %v147_v7 }
  0xb7   :  { %v155_v6 = vadd.f32 %v154_v5, %v153_v4 }
  0xb9   :  { %v156_v10 = vrot.slane %v155_v6, 1 }
  0xbb   :  { %v157_v11 = vadd.f32 %v156_v10, %v155_v6 }
  0xbd   :  { %203 = vpush %v157_v11 }
  0xbe   :  { %205 = vpush %v167_v12 }
  0xe6   :  { %s202_s0 = spop %201 }
  0xe7   :  { %v178_v18 = vstv %s202_s0 }
  0xee   :  { %s204_s1 = spop %203 }
  0xef   :  { %v176_v15 = vstv %s204_s1  ;;  %s206_s17 = spop %205 }
  0xf0   :  { %v174_v16 = vstv %s206_s17 }
  0xf1   :  { %v175_v17 = vsel %vm173_vm8, %v174_v16, 0.0 }
  0xf2   :  { %v177_v19 = vsel %vm172_vm9, %v176_v15, %v175_v17 }
  0xf3   :  { %v179_v20 = vsel %vm171_vm10, %v178_v18, %v177_v19 }
  0xf4   :  { %180 = vst [vmem:[%s253_s2] sm:$0xff] %v179_v20 }

</bundles_post_ra>
